<compile_context>
chip_gen: v7x
topology: tpu7x:2x2x1
jax: 0.10.0
libtpu: 0.0.40
codegen_flags: <defaults>
</compile_context>

<pallas_src>
import jax
import jax.numpy as jnp
from jax.experimental import pallas as pl
from jax.experimental.pallas import tpu as pltpu

HID_PAD = 128  # hidden feature lanes (30/50/30 -> 128); hidden acts never hit HBM


def _round_up(x, m):
    return ((x + m - 1) // m) * m


def mlp_kernel(x_ref, w1_ref, b1_ref, w2_ref, b2_ref,
               w3_ref, b3_ref, w4_ref, b4_ref, out_ref):
    """Fused forward for one (TB, in_features) batch tile.

    Four matmuls + bias adds + 3 ReLUs run back-to-back in f32; intermediates
    never leave vregs/VMEM.  Layer 1 contracts the raw (unpadded) feature dim,
    layer 4 produces only the 8 padded output lanes that are written to HBM.
    """
    x = x_ref[...]                                                # (TB, IN) f32

    h = jnp.dot(x, w1_ref[...], preferred_element_type=jnp.float32) + b1_ref[...]
    h = jnp.maximum(h, 0.0)                                       # (TB, 128)

    h = jnp.dot(h, w2_ref[...], preferred_element_type=jnp.float32) + b2_ref[...]
    h = jnp.maximum(h, 0.0)                                       # (TB, 128)

    h = jnp.dot(h, w3_ref[...], preferred_element_type=jnp.float32) + b3_ref[...]
    h = jnp.maximum(h, 0.0)                                       # (TB, 128)

    q = jnp.dot(h, w4_ref[...], preferred_element_type=jnp.float32) + b4_ref[...]
    out_ref[...] = q.astype(out_ref.dtype)                        # (TB, OUT_PAD)


def network_forward(state, padded_params, nb_action):
    """state: (B, input_size) f32.  padded_params: lane-padded f32 weights/biases."""
    B, in_features = state.shape
    out_pad = padded_params["w4"].shape[1]

    # Batch tile:
    #  * 8-row floor for tiny batches,
    #  * >= 2 grid steps whenever B >= 16 so v7x's second TensorCore gets work,
    #  * capped at 2048 rows to amortize per-grid-step overhead while staying
    #    well inside the scoped VMEM default.
    B8 = _round_up(max(B, 1), 8)
    if B8 >= 16:
        TB = min(2048, _round_up(pl.cdiv(B8, 2), 8))
    else:
        TB = B8
    B_pad = _round_up(B8, TB)
    grid = (B_pad // TB,)

    # Only the batch dim is padded (zero rows are stripped after the call);
    # the feature dim stays at in_features so the input DMA is ~20 B/row.
    if B_pad != B:
        x = jnp.zeros((B_pad, in_features), state.dtype).at[:B].set(state)
    else:
        x = state

    resident = lambda i: (0, 0)  # constant index_map: fetched once, VMEM-resident
    in_specs = [pl.BlockSpec((TB, in_features), lambda i: (i, 0))]
    for layer in range(1, 5):
        in_specs.append(pl.BlockSpec(padded_params[f"w{layer}"].shape, resident))
        in_specs.append(pl.BlockSpec(padded_params[f"b{layer}"].shape, resident))
    out_spec = pl.BlockSpec((TB, out_pad), lambda i: (i, 0))

    out_padded = pl.pallas_call(
        mlp_kernel,
        out_shape=jax.ShapeDtypeStruct((B_pad, out_pad), jnp.float32),
        grid=grid,
        in_specs=in_specs,
        out_specs=out_spec,
        compiler_params=pltpu.CompilerParams(
            dimension_semantics=("parallel",)),  # v7x: shard batch tiles over 2 TCs
    )(x,
      padded_params["w1"], padded_params["b1"],
      padded_params["w2"], padded_params["b2"],
      padded_params["w3"], padded_params["b3"],
      padded_params["w4"], padded_params["b4"])

    # Strip batch padding and the padded output lanes.
    return out_padded[:B, :nb_action]


def init_params(key, input_size=5, nb_action=3):
    """nn.Linear-style init; weights kept logically as (in, out) = W.T of PyTorch."""
    dims = [(input_size, 30), (30, 50), (50, 30), (30, nb_action)]
    params = {}
    for i, (fan_in, fan_out) in enumerate(dims, start=1):
        key, kw, kb = jax.random.split(key, 3)
        bound = 1.0 / jnp.sqrt(fan_in)
        params[f"w{i}"] = jax.random.uniform(
            kw, (fan_in, fan_out), jnp.float32, -bound, bound)
        params[f"b{i}"] = jax.random.uniform(
            kb, (fan_out,), jnp.float32, -bound, bound)
    return params


def pad_params(params, input_size=5, nb_action=3):
    """One-time layout prep (all f32, exact):

      layer1: (input_size, 128)   -- contracting dim left unpadded
      layer2: (128, 128)
      layer3: (128, 128)
      layer4: (128, OUT_PAD=8)    -- narrow output -> 16x fewer write bytes

    Zero padding is mathematically exact: padded weight rows/cols contribute 0,
    padded hidden lanes get bias 0 and stay 0 through ReLU, padded output lanes
    are sliced away by the wrapper.
    """
    out_pad = max(8, _round_up(nb_action, 8))
    pad_in = [input_size, HID_PAD, HID_PAD, HID_PAD]
    pad_out = [HID_PAD, HID_PAD, HID_PAD, out_pad]
    padded = {}
    for i in range(1, 5):
        w = params[f"w{i}"]
        b = params[f"b{i}"]
        wi, wo = pad_in[i - 1], pad_out[i - 1]
        padded[f"w{i}"] = jnp.zeros((wi, wo), jnp.float32).at[
            :w.shape[0], :w.shape[1]].set(w)
        padded[f"b{i}"] = jnp.zeros((1, wo), jnp.float32).at[
            0, :b.shape[0]].set(b)
    return padded


def reference_forward(state, params):
    """Pure-XLA f32 reference identical to the PyTorch Network.forward."""
    x = state
    for i in range(1, 5):
        x = jnp.dot(x, params[f"w{i}"],
                    preferred_element_type=jnp.float32) + params[f"b{i}"]
        if i < 4:
            x = jnp.maximum(x, 0.0)
    return x


if __name__ == "__main__":
    key = jax.random.PRNGKey(0)
    key_p, key_x1, key_x2 = jax.random.split(key, 3)

    input_size, nb_action = 5, 3
    params = init_params(key_p, input_size=input_size, nb_action=nb_action)
    padded = pad_params(params, input_size=input_size, nb_action=nb_action)

    # Two batch sizes: tiny (single 8-row tile) and one that exercises batch
    # padding plus a >=2-step grid (the v7x two-TensorCore path).
    for batch, kx in ((2, key_x1), (37, key_x2)):
        state = jax.random.normal(kx, (batch, input_size), jnp.float32)
        q_value = network_forward(state, padded, nb_action)
        jax.block_until_ready(q_value)

        q_ref = reference_forward(state, params)
        assert q_value.shape == (batch, nb_action)
        assert jnp.allclose(q_value, q_ref, atol=1e-3, rtol=1e-3), float(
            jnp.max(jnp.abs(q_value - q_ref)))

    print("KERNEL_OK")
</pallas_src>

<mosaic_0001>
module attributes {stable_mosaic.version = 11 : i64} {
  func.func @mlp_kernel(%arg0: i32, %arg1: memref<8x5xf32, #tpu.memory_space<vmem>>, %arg2: memref<5x128xf32, #tpu.memory_space<vmem>>, %arg3: memref<1x128xf32, #tpu.memory_space<vmem>>, %arg4: memref<128x128xf32, #tpu.memory_space<vmem>>, %arg5: memref<1x128xf32, #tpu.memory_space<vmem>>, %arg6: memref<128x128xf32, #tpu.memory_space<vmem>>, %arg7: memref<1x128xf32, #tpu.memory_space<vmem>>, %arg8: memref<128x8xf32, #tpu.memory_space<vmem>>, %arg9: memref<1x8xf32, #tpu.memory_space<vmem>>, %arg10: memref<8x8xf32, #tpu.memory_space<vmem>>) attributes {dimension_semantics = [#tpu.dimension_semantics<parallel>], iteration_bounds = array<i64: 1>, scalar_prefetch = 0 : i64, scratch_operands = 0 : i64, tpu.core_type = #tpu.core_type<tc>, window_params = [{transform_indices = @transform_0, window_bounds = array<i64: 8, 5>}, {pipeline_mode = #tpu.pipeline_mode<synchronous>, transform_indices = @transform_1, window_bounds = array<i64: 5, 128>}, {pipeline_mode = #tpu.pipeline_mode<synchronous>, transform_indices = @transform_2, window_bounds = array<i64: 1, 128>}, {pipeline_mode = #tpu.pipeline_mode<synchronous>, transform_indices = @transform_3, window_bounds = array<i64: 128, 128>}, {pipeline_mode = #tpu.pipeline_mode<synchronous>, transform_indices = @transform_4, window_bounds = array<i64: 1, 128>}, {pipeline_mode = #tpu.pipeline_mode<synchronous>, transform_indices = @transform_5, window_bounds = array<i64: 128, 128>}, {pipeline_mode = #tpu.pipeline_mode<synchronous>, transform_indices = @transform_6, window_bounds = array<i64: 1, 128>}, {pipeline_mode = #tpu.pipeline_mode<synchronous>, transform_indices = @transform_7, window_bounds = array<i64: 128, 8>}, {pipeline_mode = #tpu.pipeline_mode<synchronous>, transform_indices = @transform_8, window_bounds = array<i64: 1, 8>}, {transform_indices = @transform_9, window_bounds = array<i64: 8, 8>}]} {
    %c0 = arith.constant 0 : index
    %c0_0 = arith.constant 0 : index
    %0 = vector.load %arg1[%c0, %c0_0] : memref<8x5xf32, #tpu.memory_space<vmem>>, vector<8x5xf32>
    %c0_1 = arith.constant 0 : index
    %c0_2 = arith.constant 0 : index
    %1 = vector.load %arg2[%c0_1, %c0_2] : memref<5x128xf32, #tpu.memory_space<vmem>>, vector<5x128xf32>
    %cst = arith.constant dense<0.000000e+00> : vector<8x128xf32>
    %2 = tpu.matmul %0, %1, %cst {dimension_numbers = #tpu.dot_dimension_numbers<[1], [0], [0], [1], [0, 0, 1, 1], [], []>} : vector<8x5xf32>, vector<5x128xf32>, vector<8x128xf32> -> vector<8x128xf32>
    %c0_3 = arith.constant 0 : index
    %c0_4 = arith.constant 0 : index
    %3 = vector.load %arg3[%c0_3, %c0_4] : memref<1x128xf32, #tpu.memory_space<vmem>>, vector<1x128xf32>
    %4 = vector.broadcast %3 : vector<1x128xf32> to vector<8x128xf32>
    %5 = arith.addf %2, %4 : vector<8x128xf32>
    %cst_5 = arith.constant 0.000000e+00 : f32
    %6 = vector.broadcast %cst_5 : f32 to vector<8x128xf32>
    %7 = arith.maximumf %5, %6 : vector<8x128xf32>
    %c0_6 = arith.constant 0 : index
    %c0_7 = arith.constant 0 : index
    %8 = vector.load %arg4[%c0_6, %c0_7] : memref<128x128xf32, #tpu.memory_space<vmem>>, vector<128x128xf32>
    %cst_8 = arith.constant dense<0.000000e+00> : vector<8x128xf32>
    %9 = tpu.matmul %7, %8, %cst_8 {dimension_numbers = #tpu.dot_dimension_numbers<[1], [0], [0], [1], [0, 0, 1, 1], [], []>} : vector<8x128xf32>, vector<128x128xf32>, vector<8x128xf32> -> vector<8x128xf32>
    %c0_9 = arith.constant 0 : index
    %c0_10 = arith.constant 0 : index
    %10 = vector.load %arg5[%c0_9, %c0_10] : memref<1x128xf32, #tpu.memory_space<vmem>>, vector<1x128xf32>
    %11 = vector.broadcast %10 : vector<1x128xf32> to vector<8x128xf32>
    %12 = arith.addf %9, %11 : vector<8x128xf32>
    %cst_11 = arith.constant 0.000000e+00 : f32
    %13 = vector.broadcast %cst_11 : f32 to vector<8x128xf32>
    %14 = arith.maximumf %12, %13 : vector<8x128xf32>
    %c0_12 = arith.constant 0 : index
    %c0_13 = arith.constant 0 : index
    %15 = vector.load %arg6[%c0_12, %c0_13] : memref<128x128xf32, #tpu.memory_space<vmem>>, vector<128x128xf32>
    %cst_14 = arith.constant dense<0.000000e+00> : vector<8x128xf32>
    %16 = tpu.matmul %14, %15, %cst_14 {dimension_numbers = #tpu.dot_dimension_numbers<[1], [0], [0], [1], [0, 0, 1, 1], [], []>} : vector<8x128xf32>, vector<128x128xf32>, vector<8x128xf32> -> vector<8x128xf32>
    %c0_15 = arith.constant 0 : index
    %c0_16 = arith.constant 0 : index
    %17 = vector.load %arg7[%c0_15, %c0_16] : memref<1x128xf32, #tpu.memory_space<vmem>>, vector<1x128xf32>
    %18 = vector.broadcast %17 : vector<1x128xf32> to vector<8x128xf32>
    %19 = arith.addf %16, %18 : vector<8x128xf32>
    %cst_17 = arith.constant 0.000000e+00 : f32
    %20 = vector.broadcast %cst_17 : f32 to vector<8x128xf32>
    %21 = arith.maximumf %19, %20 : vector<8x128xf32>
    %c0_18 = arith.constant 0 : index
    %c0_19 = arith.constant 0 : index
    %22 = vector.load %arg8[%c0_18, %c0_19] : memref<128x8xf32, #tpu.memory_space<vmem>>, vector<128x8xf32>
    %cst_20 = arith.constant dense<0.000000e+00> : vector<8x8xf32>
    %23 = tpu.matmul %21, %22, %cst_20 {dimension_numbers = #tpu.dot_dimension_numbers<[1], [0], [0], [1], [0, 0, 1, 1], [], []>} : vector<8x128xf32>, vector<128x8xf32>, vector<8x8xf32> -> vector<8x8xf32>
    %c0_21 = arith.constant 0 : index
    %c0_22 = arith.constant 0 : index
    %24 = vector.load %arg9[%c0_21, %c0_22] : memref<1x8xf32, #tpu.memory_space<vmem>>, vector<1x8xf32>
    %25 = vector.broadcast %24 : vector<1x8xf32> to vector<8x8xf32>
    %26 = arith.addf %23, %25 : vector<8x8xf32>
    %c0_23 = arith.constant 0 : index
    %c0_24 = arith.constant 0 : index
    %27 = vector.load %arg10[%c0_23, %c0_24] : memref<8x8xf32, #tpu.memory_space<vmem>>, vector<8x8xf32>
    tpu.vector_store %arg10[%c0_23, %c0_24], %26 {strides = array<i32>} : memref<8x8xf32, #tpu.memory_space<vmem>>, vector<8x8xf32>,
    return
  }
  func.func @transform_0(%arg0: i32) -> (i32, i32) {
    %c0_i32 = arith.constant 0 : i32
    %c0_i32_0 = arith.constant 0 : i32
    return %arg0, %c0_i32 : i32, i32
  }
  func.func @transform_1(%arg0: i32) -> (i32, i32) {
    %c0_i32 = arith.constant 0 : i32
    %c0_i32_0 = arith.constant 0 : i32
    %c0_i32_1 = arith.constant 0 : i32
    return %c0_i32, %c0_i32_0 : i32, i32
  }
  func.func @transform_2(%arg0: i32) -> (i32, i32) {
    %c0_i32 = arith.constant 0 : i32
    %c0_i32_0 = arith.constant 0 : i32
    %c0_i32_1 = arith.constant 0 : i32
    return %c0_i32, %c0_i32_0 : i32, i32
  }
  func.func @transform_3(%arg0: i32) -> (i32, i32) {
    %c0_i32 = arith.constant 0 : i32
    %c0_i32_0 = arith.constant 0 : i32
    %c0_i32_1 = arith.constant 0 : i32
    return %c0_i32, %c0_i32_0 : i32, i32
  }
  func.func @transform_4(%arg0: i32) -> (i32, i32) {
    %c0_i32 = arith.constant 0 : i32
    %c0_i32_0 = arith.constant 0 : i32
    %c0_i32_1 = arith.constant 0 : i32
    return %c0_i32, %c0_i32_0 : i32, i32
  }
  func.func @transform_5(%arg0: i32) -> (i32, i32) {
    %c0_i32 = arith.constant 0 : i32
    %c0_i32_0 = arith.constant 0 : i32
    %c0_i32_1 = arith.constant 0 : i32
    return %c0_i32, %c0_i32_0 : i32, i32
  }
  func.func @transform_6(%arg0: i32) -> (i32, i32) {
    %c0_i32 = arith.constant 0 : i32
    %c0_i32_0 = arith.constant 0 : i32
    %c0_i32_1 = arith.constant 0 : i32
    return %c0_i32, %c0_i32_0 : i32, i32
  }
  func.func @transform_7(%arg0: i32) -> (i32, i32) {
    %c0_i32 = arith.constant 0 : i32
    %c0_i32_0 = arith.constant 0 : i32
    %c0_i32_1 = arith.constant 0 : i32
    return %c0_i32, %c0_i32_0 : i32, i32
  }
  func.func @transform_8(%arg0: i32) -> (i32, i32) {
    %c0_i32 = arith.constant 0 : i32
    %c0_i32_0 = arith.constant 0 : i32
    %c0_i32_1 = arith.constant 0 : i32
    return %c0_i32, %c0_i32_0 : i32, i32
  }
  func.func @transform_9(%arg0: i32) -> (i32, i32) {
    %c0_i32 = arith.constant 0 : i32
    %c0_i32_0 = arith.constant 0 : i32
    return %arg0, %c0_i32 : i32, i32
  }
}

</mosaic_0001>

<bundles_post_ra>
// kernel: tpu_custom_call.1
= control target key start
LH: loop header
LB: loop body
LE: loop exit
PB: predicated region body
PF: predicated region fallthrough
CT: control target
= control target key end

     0   :  { %14 = vsyncpa [#allocation3], 0  ;;  %s1012_s0 = inlined_call_operand.vmem [shape: f32[8,5], index: 0, kind: input, shape index: {}]   ;;  %s1013_s1 = inlined_call_operand.hbm [shape: f32[5,128], index: 1, kind: input, shape index: {}]   ;;  %s1014_s2 = inlined_call_operand.vmem [shape: f32[1,128], index: 2, kind: input, shape index: {}]   ;;  %s1015_s3 = inlined_call_operand.vmem [shape: f32[128,128], index: 3, kind: input, shape index: {}]   ;;  %s1016_s4 = inlined_call_operand.vmem [shape: f32[1,128], index: 4, kind: input, shape index: {}]   ;;  %s1017_s5 = inlined_call_operand.hbm [shape: f32[128,128], index: 5, kind: input, shape index: {}]   ;;  %s1018_s6 = inlined_call_operand.vmem [shape: f32[1,128], index: 6, kind: input, shape index: {}]   ;;  %s1019_s7 = inlined_call_operand.vmem [shape: f32[128,8], index: 7, kind: input, shape index: {}]   ;;  %s1020_s8 = inlined_call_operand.vmem [shape: f32[1,8], index: 8, kind: input, shape index: {}]   ;;  %s1021_s9 = inlined_call_operand.hbm [shape: f32[8,8], index: 9, kind: output, shape index: {}]  }
   0x1   :  { %15 = vsyncpa [#allocation6], 0 }
   0x2   :  { %16 = vsyncpa [#allocation4], 0  ;;  %s767_s30 = smov [#allocation2]   ;;  %s768_s11 = smov [#allocation5]  }
   0x3   :  { %s25_s10 = sshll.u32 %s767_s30, 4  ;;  %s40_s12 = sshll.u32 %s768_s11, 4  ;;  %s26_s10 = int_to_ptr.vmem [resolvable:$true] %s25_s10  ;;  %s825_s12 = int_to_ptr.vmem [resolvable:$true] %s40_s12 }
   0x4   :  { %s695_s15 = scalar_lea.hbm %s1013_s1, 128 }
   0x5   :  { %p696_p0 = scmp.ne.s32.totalorder %s1013_s1, %s695_s15  ;;  %p699_p1 = scmp.lt.u32.totalorder %s695_s15, %s1013_s1 }
   0x7   :  { %p701_p2 = pnand %p699_p1, %p696_p0 }
   0x9   :  { %704 = shalt.err (!%p701_p2)
}
   0xa   :  { %s705_s20 = scalar_lea.vmem %s26_s10, 128  ;;  %p710_p4 = scmp.lt.s32.totalorder %s26_s10, %s26_s10 }
   0xb   :  { %p706_p3 = scmp.ne.s32.totalorder %s26_s10, %s705_s20  ;;  %p711_p5 = scmp.lt.s32.totalorder %s705_s20, %s705_s20 }
   0xd   :  { %p712_p6 = por %p711_p5, %p710_p4 }
   0xf   :  { %p713_p7 = pnand %p712_p6, %p706_p3 }
  0x11   :  { %716 = shalt.err (!%p713_p7)
}
  0x12   :  { %28 = dma.hbm_to_vmem [thread:$0]  %s1013_s1, 128, %s26_s10, [#allocation3]  }
  0x13   :  { %s717_s25 = scalar_lea.hbm %s1017_s5, 2048 }
  0x14   :  { %p718_p8 = scmp.ne.s32.totalorder %s1017_s5, %s717_s25  ;;  %p721_p9 = scmp.lt.u32.totalorder %s717_s25, %s1017_s5 }
  0x16   :  { %p723_p10 = pnand %p721_p9, %p718_p8 }
  0x18   :  { %726 = shalt.err (!%p723_p10)
}
  0x19   :  { %s727_s30 = scalar_lea.vmem %s825_s12, 2048  ;;  %p732_p12 = scmp.lt.s32.totalorder %s825_s12, %s825_s12 }
  0x1a   :  { %p728_p11 = scmp.ne.s32.totalorder %s825_s12, %s727_s30  ;;  %p733_p13 = scmp.lt.s32.totalorder %s727_s30, %s727_s30 }
  0x1c   :  { %p734_p0 = por %p733_p13, %p732_p12 }
  0x1e   :  { %p735_p1 = pnand %p734_p0, %p728_p11 }
  0x20   :  { %738 = shalt.err (!%p735_p1)
}
  0x21   :  { %s769_s1 = smov 128   ;;  %s770_s10 = smov 8  }
  0x22   :  { %46 = dma.hbm_to_vmem [thread:$0]  %s1017_s5, 2048, %s825_s12, [#allocation6], %s769_s1, %s769_s1, %s770_s10  }
  0x23   :  { %761 = dma.done.wait [#allocation3], 128  }
  0x24   :  { %762 = vsyncadd [#allocation3], 4294967168 }
  0x25   :  { %763 = dma.done.wait [#allocation6], 2048  }
  0x26   :  { %764 = vsyncadd [#allocation6], 4294965248  ;;  %v771_v0 = vmov 0.0   ;;  %vm772_vm0 = vmmov 0   ;;  %v773_v1 = vmov 0.0|0.0   ;;  %vm72_vm1 = vcmask 1044480  }
  0x27   :  { %505 = vmatprep.subr.mxu0 %v771_v0  ;;  %507 = vmatprep.mubr.msk.f32.mxu0 %vm772_vm0, %v771_v0  ;;  %vm68_vm2 = vcmask 39936   ;;  %v60_v2 = vld [vmem:[#allocation2] sm:$0x1f]  ;;  %v148_v5 = vld [vmem:[%s1015_s3 + $0x8] sm:$0xff]  ;;  %v149_v6 = vld [vmem:[%s1015_s3 + $0x10] sm:$0xff]  ;;  %s774_s10 = smov [#allocation7]  }
  0x28   :  { %615 = vmatprep.subr.bf16.mxu1 %v773_v1  ;;  %542 = vmatprep.mubr.msk.f32.mxu1 %vm772_vm0, %v771_v0  ;;  %v59_v3 = vld [vmem:[%s1012_s0] sm:$0xff]  ;;  %v150_v7 = vld [vmem:[%s1015_s3 + $0x18] sm:$0xff]  ;;  %v152_v11 = vld [vmem:[%s1015_s3 + $0x28] sm:$0xff]  ;;  %s436_s11 = sshll.u32 %s774_s10, 4  ;;  %vm428_vm3 = vcmask 64512   ;;  %s437_s11 = int_to_ptr.vmem [resolvable:$true] %s436_s11 }
  0x29   :  { %v147_v4 = vld [vmem:[%s1015_s3] sm:$0xff]  ;;  %506 = vmatpush3.msk.msra.mxu0 %vm72_vm1, %v60_v2  ;;  %v619_v9 = vpack.c.bf16 %v150_v7, %v149_v6  ;;  %v153_v13 = vld [vmem:[%s1015_s3 + $0x30] sm:$0xff]  ;;  %v154_v14 = vld [vmem:[%s1015_s3 + $0x38] sm:$0xff]  ;;  %p744_p3 = scmp.lt.s32.totalorder %s437_s11, %s437_s11 }
  0x2a   :  { %508 = vmatmul.mubr.msk.f32.vlgmr.msra.gmra.mrb[0].mxu0 %vm68_vm2, %v59_v3  ;;  %v616_v8 = vpack.c.bf16 %v148_v5, %v147_v4  ;;  %639 = vmatprep.subr.bf16.mxu0 %v773_v1  ;;  %v151_v10 = vld [vmem:[%s1015_s3 + $0x20] sm:$0xff]  ;;  %v625_v15 = vpack.c.bf16 %v154_v14, %v153_v13  ;;  %v156_v17 = vld [vmem:[%s1015_s3 + $0x48] sm:$0xff]  ;;  %v157_v19 = vld [vmem:[%s1015_s3 + $0x50] sm:$0xff] }
  0x2b   :  { %577 = vmatprep.mubr.msk.f32.mxu0 %vm772_vm0, %v771_v0  ;;  %v622_v12 = vpack.c.bf16 %v152_v11, %v151_v10  ;;  %v155_v16 = vld [vmem:[%s1015_s3 + $0x40] sm:$0xff]  ;;  %v158_v20 = vld [vmem:[%s1015_s3 + $0x58] sm:$0xff]  ;;  %v160_v23 = vld [vmem:[%s1015_s3 + $0x68] sm:$0xff] }
  0x2c   :  { %617 = vmatpush3.bf16.msra.mxu1 %v616_v8  ;;  %v628_v18 = vpack.c.bf16 %v156_v17, %v155_v16  ;;  %v631_v21 = vpack.c.bf16 %v158_v20, %v157_v19  ;;  %v159_v22 = vld [vmem:[%s1015_s3 + $0x60] sm:$0xff]  ;;  %v161_v25 = vld [vmem:[%s1015_s3 + $0x70] sm:$0xff]  ;;  %v162_v26 = vld [vmem:[%s1015_s3 + $0x78] sm:$0xff] }
  0x2d   :  { %618 = vmatprep.subr.bf16.mxu1 %v773_v1  ;;  %v634_v24 = vpack.c.bf16 %v160_v23, %v159_v22  ;;  %v637_v27 = vpack.c.bf16 %v162_v26, %v161_v25  ;;  %v241_v28 = vld [vmem:[#allocation5] sm:$0xff]  ;;  %v242_v29 = vld [vmem:[#allocation5 + $0x8] sm:$0xff]  ;;  %v243_v30 = vld [vmem:[#allocation5 + $0x10] sm:$0xff] }
  0x2e   :  { %v640_v31 = vpack.c.bf16 %v242_v29, %v241_v28  ;;  %v244_v32 = vld [vmem:[#allocation5 + $0x18] sm:$0xff]  ;;  %v245_v34 = vld [vmem:[#allocation5 + $0x20] sm:$0xff]  ;;  %v246_v35 = vld [vmem:[#allocation5 + $0x28] sm:$0xff] }
  0x2f   :  { %v643_v33 = vpack.c.bf16 %v244_v32, %v243_v30  ;;  %v646_v36 = vpack.c.bf16 %v246_v35, %v245_v34  ;;  %v247_v37 = vld [vmem:[#allocation5 + $0x30] sm:$0xff]  ;;  %v248_v38 = vld [vmem:[#allocation5 + $0x38] sm:$0xff]  ;;  %v249_v40 = vld [vmem:[#allocation5 + $0x40] sm:$0xff] }
  0x30   :  { %620 = vmatpush3.bf16.msra.mxu1 %v619_v9  ;;  %641 = vmatpush3.bf16.msra.mxu0 %v640_v31  ;;  %v649_v39 = vpack.c.bf16 %v248_v38, %v247_v37  ;;  %v250_v41 = vld [vmem:[#allocation5 + $0x48] sm:$0xff]  ;;  %v251_v43 = vld [vmem:[#allocation5 + $0x50] sm:$0xff]  ;;  %v252_v44 = vld [vmem:[#allocation5 + $0x58] sm:$0xff] }
  0x31   :  { %621 = vmatprep.subr.bf16.mxu1 %v773_v1  ;;  %642 = vmatprep.subr.bf16.mxu0 %v773_v1  ;;  %v652_v42 = vpack.c.bf16 %v250_v41, %v249_v40  ;;  %v655_v45 = vpack.c.bf16 %v252_v44, %v251_v43  ;;  %v253_v46 = vld [vmem:[#allocation5 + $0x60] sm:$0xff]  ;;  %v254_v47 = vld [vmem:[#allocation5 + $0x68] sm:$0xff]  ;;  %v446_v49 = vld [vmem:[%s1014_s2] ss:$0 sm:$0xff] }
  0x32   :  { %v658_v48 = vpack.c.bf16 %v254_v47, %v253_v46  ;;  %v255_v54 = vld [vmem:[#allocation5 + $0x70] sm:$0xff]  ;;  %v256_v55 = vld [vmem:[#allocation5 + $0x78] sm:$0xff]  ;;  %v336_v58 = vld [vmem:[%s1019_s7 + $0x8] sm:$0xff] }
  0x33   :  { %v661_v56 = vpack.c.bf16 %v256_v55, %v255_v54  ;;  %v335_v57 = vld [vmem:[%s1019_s7] sm:$0xff]  ;;  %v337_v59 = vld [vmem:[%s1019_s7 + $0x10] sm:$0xff]  ;;  %v338_v61 = vld [vmem:[%s1019_s7 + $0x18] sm:$0xff] }
  0x34   :  { %623 = vmatpush3.bf16.msra.mxu1 %v622_v12  ;;  %644 = vmatpush3.bf16.msra.mxu0 %v643_v33  ;;  %v664_v60 = vpack.c.bf16 %v336_v58, %v335_v57  ;;  %v667_v62 = vpack.c.bf16 %v338_v61, %v337_v59  ;;  %v339_v63 = vld [vmem:[%s1019_s7 + $0x20] sm:$0xff]  ;;  %v341_v3 = vld [vmem:[%s1019_s7 + $0x30] sm:$0xff]  ;;  %v342_v4 = vld [vmem:[%s1019_s7 + $0x38] sm:$0xff] }
  0x35   :  { %624 = vmatprep.subr.bf16.mxu1 %v773_v1  ;;  %645 = vmatprep.subr.bf16.mxu0 %v773_v1  ;;  %v673_v5 = vpack.c.bf16 %v342_v4, %v341_v3  ;;  %v343_v6 = vld [vmem:[%s1019_s7 + $0x40] sm:$0xff]  ;;  %v344_v7 = vld [vmem:[%s1019_s7 + $0x48] sm:$0xff]  ;;  %v345_v9 = vld [vmem:[%s1019_s7 + $0x50] sm:$0xff] }
  0x36   :  { %v676_v8 = vpack.c.bf16 %v344_v7, %v343_v6  ;;  %v346_v10 = vld [vmem:[%s1019_s7 + $0x58] sm:$0xff]  ;;  %v347_v12 = vld [vmem:[%s1019_s7 + $0x60] sm:$0xff]  ;;  %v348_v13 = vld [vmem:[%s1019_s7 + $0x68] sm:$0xff] }
  0x37   :  { %v679_v11 = vpack.c.bf16 %v346_v10, %v345_v9  ;;  %v682_v14 = vpack.c.bf16 %v348_v13, %v347_v12  ;;  %v349_v20 = vld [vmem:[%s1019_s7 + $0x70] sm:$0xff] }
  0x38   :  { %626 = vmatpush3.bf16.msra.mxu1 %v625_v15  ;;  %647 = vmatpush3.bf16.msra.mxu0 %v646_v36  ;;  %v449_v15 = vld [vmem:[%s1016_s4] ss:$0 sm:$0xff] }
  0x39   :  { %627 = vmatprep.subr.bf16.mxu1 %v773_v1  ;;  %648 = vmatprep.subr.bf16.mxu0 %v773_v1 }
  0x3c   :  { %629 = vmatpush3.bf16.msra.mxu1 %v628_v18  ;;  %650 = vmatpush3.bf16.msra.mxu0 %v649_v39 }
  0x3d   :  { %630 = vmatprep.subr.bf16.mxu1 %v773_v1  ;;  %651 = vmatprep.subr.bf16.mxu0 %v773_v1 }
  0x40   :  { %632 = vmatpush3.bf16.msra.mxu1 %v631_v21  ;;  %653 = vmatpush3.bf16.msra.mxu0 %v652_v42  ;;  %v350_v21 = vld [vmem:[%s1019_s7 + $0x78] sm:$0xff] }
  0x41   :  { %633 = vmatprep.subr.bf16.mxu1 %v773_v1  ;;  %654 = vmatprep.subr.bf16.mxu0 %v773_v1  ;;  %v685_v22 = vpack.c.bf16 %v350_v21, %v349_v20 }
  0x44   :  { %635 = vmatpush3.bf16.msra.mxu1 %v634_v24  ;;  %656 = vmatpush3.bf16.msra.mxu0 %v655_v45 }
  0x45   :  { %636 = vmatprep.subr.bf16.mxu1 %v773_v1  ;;  %657 = vmatprep.subr.bf16.mxu0 %v773_v1 }
  0x48   :  { %638 = vmatpush3.bf16.msra.mxu1 %v637_v27  ;;  %659 = vmatpush3.bf16.msra.mxu0 %v658_v48  ;;  %v451_v27 = vld [vmem:[%s1020_s8] ss:$0 sm:$0xff] }
  0x49   :  { %663 = vmatprep.subr.bf16.mxu1 %v773_v1  ;;  %660 = vmatprep.subr.bf16.mxu0 %v773_v1 }
  0x4c   :  { %662 = vmatpush3.bf16.msra.mxu0 %v661_v56 }
  0xfd   :  { %v142_v50 = vpop.f32.mrb[0].mxu0 }
  0xfe   :  { %v143_v51 = vadd.f32 %v446_v49, %v142_v50  ;;  %v509_v52 = vpop.f32.mrb[1].mxu0 }
 0x100   :  { %v146_v53 = vmax.f32 %v143_v51, 0.0 }
 0x102   :  { %543 = vmatmul.mubr.f32.vlgmr.msra.gmra.mrb[0].mxu1 %v146_v53 }
 0x103   :  { %612 = vmatprep.mubr.msk.f32.mxu1 %vm772_vm0, %v771_v0  ;;  %665 = vmatpush3.bf16.msra.mxu1 %v664_v60  ;;  %v340_v0 = vld [vmem:[%s1019_s7 + $0x28] sm:$0xff]  ;;  %s739_s7 = scalar_lea.vmem %s437_s11, 128 }
 0x104   :  { %666 = vmatprep.subr.bf16.mxu1 %v773_v1  ;;  %v670_v2 = vpack.c.bf16 %v340_v0, %v339_v63  ;;  %p740_p2 = scmp.ne.s32.totalorder %s437_s11, %s739_s7  ;;  %p745_p4 = scmp.lt.s32.totalorder %s739_s7, %s739_s7 }
 0x106   :  { %p746_p5 = por %p745_p4, %p744_p3 }
 0x107   :  { %668 = vmatpush3.bf16.msra.mxu1 %v667_v62 }
 0x108   :  { %669 = vmatprep.subr.bf16.mxu1 %v773_v1  ;;  %p747_p6 = pnand %p746_p5, %p740_p2 }
 0x10b   :  { %671 = vmatpush3.bf16.msra.mxu1 %v670_v2 }
 0x10c   :  { %672 = vmatprep.subr.bf16.mxu1 %v773_v1 }
 0x10f   :  { %674 = vmatpush3.bf16.msra.mxu1 %v673_v5 }
 0x110   :  { %675 = vmatprep.subr.bf16.mxu1 %v773_v1 }
 0x113   :  { %677 = vmatpush3.bf16.msra.mxu1 %v676_v8 }
 0x114   :  { %678 = vmatprep.subr.bf16.mxu1 %v773_v1 }
 0x117   :  { %680 = vmatpush3.bf16.msra.mxu1 %v679_v11 }
 0x118   :  { %681 = vmatprep.subr.bf16.mxu1 %v773_v1 }
 0x11b   :  { %683 = vmatpush3.bf16.msra.mxu1 %v682_v14 }
 0x11c   :  { %684 = vmatprep.subr.bf16.mxu1 %v773_v1  ;;  %v450_v1 = vld [vmem:[%s1018_s6] ss:$0 sm:$0xff] }
 0x11f   :  { %686 = vmatpush3.bf16.msra.mxu1 %v685_v22 }
 0x1d5   :  { %v236_v16 = vpop.f32.mrb[0].mxu1 }
 0x1d6   :  { %v237_v17 = vadd.f32 %v449_v15, %v236_v16  ;;  %v544_v18 = vpop.f32.mrb[1].mxu1 }
 0x1d8   :  { %v240_v19 = vmax.f32 %v237_v17, 0.0 }
 0x1da   :  { %578 = vmatmul.mubr.f32.vlgmr.msra.gmra.mrb[2].mxu0 %v240_v19 }
 0x2ad   :  { %v330_v23 = vpop.f32.mrb[2].mxu0 }
 0x2ae   :  { %v331_v24 = vadd.f32 %v450_v1, %v330_v23  ;;  %v579_v25 = vpop.f32.mrb[3].mxu0 }
 0x2b0   :  { %v334_v26 = vmax.f32 %v331_v24, 0.0 }
 0x2b2   :  { %613 = vmatmul.mubr.f32.vlgmr.msra.gmra.mrb[2].mxu1 %v334_v26 }
 0x385   :  { %v424_v28 = vpop.f32.mrb[2].mxu1 }
 0x386   :  { %v425_v29 = vadd.f32 %v451_v27, %v424_v28  ;;  %v614_v30 = vpop.f32.mrb[3].mxu1 }
 0x388   :  { %429 = vst.msk [vmem:[#allocation7] sm:$0xff] %vm428_vm3, %v425_v29 }
 0x389   :  { %750 = shalt.err (!%p747_p6)
}
 0x38a   :  { %s751_s5 = scalar_lea.hbm %s1021_s9, 128 }
 0x38b   :  { %p752_p7 = scmp.ne.s32.totalorder %s1021_s9, %s751_s5  ;;  %p755_p8 = scmp.lt.u32.totalorder %s751_s5, %s1021_s9 }
 0x38d   :  { %p757_p9 = pnand %p755_p8, %p752_p7 }
 0x38f   :  { %760 = shalt.err (!%p757_p9)
}
 0x390   :  { %439 = dma.vmem_to_hbm [thread:$0]  %s437_s11, 128, %s1021_s9, [#allocation4]  }
 0x391   :  { %765 = dma.done.wait [#allocation4], 128  }
 0x392   :  { %766 = vsyncadd [#allocation4], 4294967168 }
 0x393   :  { %443 = vsyncpa [#allocation3], 1 }
 0x394   :  { %444 = vsyncpa [#allocation6], 1 }
 0x395   :  { %445 = vsyncpa [#allocation4], 1 }

</bundles_post_ra>
